<compile_context>
chip_gen: v6e
topology: v6e:2x2x1
jax: 0.10.0
libtpu: 0.0.40
codegen_flags: <defaults>
</compile_context>

<pallas_src>
import math

import jax
import jax.numpy as jnp
from jax.experimental import pallas as pl
from jax.experimental.pallas import tpu as pltpu

LANE = 128  # TPU lane width


def _round_up(x, m):
    return ((x + m - 1) // m) * m


# -----------------------------------------------------------------------------
# Fused kernel: per-turn embedding gather + Linear + Softmax + argmax
# -----------------------------------------------------------------------------
def chatbot_kernel(tok_ref, emb_ref, h_ref, wt_ref, b_ref,
                   embeds_ref, probs_ref, action_ref):
    t = pl.program_id(0)                 # dialog turn
    B = embeds_ref.shape[0]

    # ---- listen_net: embedding row gather, coalesced ----------------------
    # tok_ref : SMEM [T, B] int32 (scalar-prefetched once for all turns)
    # emb_ref : VMEM [V_in, 1, E_pad] (leading dim untiled -> cheap dyn index)
    # NOTE: no runtime bounds check on token ids; an id >= V_in reads garbage.
    rows = [emb_ref[tok_ref[t, b]] for b in range(B)]     # each [1, E_pad]
    embeds_ref[...] = jnp.concatenate(rows, axis=0)        # ONE [B, E_pad] store

    # ---- act(): speak_net (Linear) + softmax + argmax ----------------------
    # h [B, H] @ wt [H, V_pad] on the MXU; padded columns carry bias = -1e30
    # (f32 only!) so they contribute exp(...) == 0 and never win the argmax.
    logits = jnp.dot(h_ref[...], wt_ref[...],
                     preferred_element_type=jnp.float32) + b_ref[...]

    m = jnp.max(logits, axis=-1, keepdims=True)
    e = jnp.exp(logits - m)
    denom = jnp.sum(e, axis=-1, keepdims=True)
    probs_ref[...] = e * pl.reciprocal(denom, approx=True)   # EUP slot

    # eval-mode action: first max index, matching torch .max(1)
    Bv, Vp = logits.shape
    idx = jax.lax.broadcasted_iota(jnp.int32, (Bv, Vp), 1)
    masked = jnp.where(logits == m, idx, Vp)
    action_ref[...] = jnp.min(masked, axis=-1, keepdims=True).astype(jnp.int32)


# -----------------------------------------------------------------------------
# Wrappers
# -----------------------------------------------------------------------------
def prepare_params(embed_table, speak_w, speak_b):
    """One-time (init) layout prep: lane-pad the embed dim, transpose + lane-pad
    the speak_net params, reshape the table so the gather hits an untiled dim."""
    V_in, E = embed_table.shape
    V_out, H = speak_w.shape
    E_pad = _round_up(max(E, LANE), LANE)
    V_pad = _round_up(max(V_out, LANE), LANE)

    emb3 = jnp.zeros((V_in, 1, E_pad), jnp.float32).at[:, 0, :E].set(embed_table)
    w_t = jnp.zeros((H, V_pad), jnp.float32).at[:, :V_out].set(speak_w.T)
    # padded logit columns get a huge negative bias -> softmax weight 0
    b_pad = jnp.full((1, V_pad), -1e30, jnp.float32).at[0, :V_out].set(speak_b)
    return emb3, w_t, b_pad


@jax.jit
def chatbot_forward(token_ids, emb3, h_states, w_t, b_pad):
    """T fused dialog turns of observe()'s embedding lookup + act()'s
    linear/softmax/argmax. Params stay VMEM-resident across the whole grid."""
    T, B = token_ids.shape
    V_in, _, E_pad = emb3.shape
    H = h_states.shape[-1]
    V_pad = w_t.shape[1]

    grid_spec = pltpu.PrefetchScalarGridSpec(
        num_scalar_prefetch=1,            # token_ids -> SMEM, passed to index_maps
        grid=(T,),
        in_specs=[
            pl.BlockSpec((V_in, 1, E_pad), lambda t, tok: (0, 0, 0)),  # embed table (resident)
            pl.BlockSpec((None, B, H),     lambda t, tok: (t, 0, 0)),  # per-turn h_state
            pl.BlockSpec((H, V_pad),       lambda t, tok: (0, 0)),     # W^T padded (resident)
            pl.BlockSpec((1, V_pad),       lambda t, tok: (0, 0)),     # bias padded (resident)
        ],
        out_specs=(
            pl.BlockSpec((None, B, E_pad), lambda t, tok: (t, 0, 0)),  # token embeds
            pl.BlockSpec((None, B, V_pad), lambda t, tok: (t, 0, 0)),  # padded probs
            pl.BlockSpec((None, B, 1),     lambda t, tok: (t, 0, 0)),  # action
        ),
    )

    return pl.pallas_call(
        chatbot_kernel,
        out_shape=(jax.ShapeDtypeStruct((T, B, E_pad), jnp.float32),
                   jax.ShapeDtypeStruct((T, B, V_pad), jnp.float32),
                   jax.ShapeDtypeStruct((T, B, 1), jnp.int32)),
        grid_spec=grid_spec,
        compiler_params=pltpu.CompilerParams(
            dimension_semantics=("arbitrary",)),
    )(token_ids, emb3, h_states, w_t, b_pad)


# -----------------------------------------------------------------------------
# Deterministic xavier_init reproduction (as in bots.py):
#   1-D params -> 0 ; 2-D params -> normal(0, sqrt(2 / (size(0) + size(1))))
# -----------------------------------------------------------------------------
def xavier_init_2d(key, shape):
    std = math.sqrt(2.0 / (shape[0] + shape[1]))
    return std * jax.random.normal(key, shape, dtype=jnp.float32)


if __name__ == "__main__":
    # opt: in_vocab_size=16, embed_size=32, hidden_size=32, out_vocab_size=32,
    # batch=8, and T=4 fused dialog turns.
    T, B, V_IN, E, H, V_OUT = 4, 8, 16, 32, 32, 32

    root = jax.random.PRNGKey(0)
    k_emb, k_w, k_tok, k_h = jax.random.split(root, 4)

    embed_table = xavier_init_2d(k_emb, (V_IN, E))        # listen_net.weight
    speak_w = xavier_init_2d(k_w, (V_OUT, H))             # speak_net.weight
    speak_b = jnp.zeros((V_OUT,), dtype=jnp.float32)      # speak_net.bias -> 0

    token_ids = jax.random.randint(k_tok, (T, B), 0, V_IN, dtype=jnp.int32)
    # h_state per turn (its recurrent update lives in the subclass LSTMCell)
    h_states = jax.random.normal(k_h, (T, B, H), dtype=jnp.float32)

    # one-time init-side layout prep (transpose + lane pad + table reshape)
    emb3, w_t, b_pad = prepare_params(embed_table, speak_w, speak_b)

    embeds_p, probs_p, action = chatbot_forward(token_ids, emb3, h_states, w_t, b_pad)
    jax.block_until_ready((embeds_p, probs_p, action))

    embeds = embeds_p[:, :, :E]       # drop lane padding
    probs = probs_p[:, :, :V_OUT]

    # correctness check against a plain-JAX reference (full f32 precision)
    ref_embeds = embed_table[token_ids]                                   # [T,B,E]
    ref_logits = jnp.einsum('tbh,vh->tbv', h_states, speak_w,
                            precision=jax.lax.Precision.HIGHEST) + speak_b
    ref_probs = jax.nn.softmax(ref_logits, axis=-1)
    ref_action = jnp.argmax(ref_logits, axis=-1)[..., None].astype(jnp.int32)

    assert jnp.allclose(embeds, ref_embeds, atol=1e-6), "embedding mismatch"
    # approx reciprocal on the EUP perturbs probs at ~1e-4..1e-3 relative
    assert jnp.allclose(probs, ref_probs, atol=5e-3, rtol=5e-3), "softmax mismatch"
    assert jnp.max(jnp.abs(probs_p[:, :, V_OUT:])) == 0.0, "padded lanes not zero"
    assert jnp.array_equal(action, ref_action), "argmax mismatch"

    print("KERNEL_OK")
</pallas_src>

<mosaic_0001>
module attributes {stable_mosaic.version = 11 : i64} {
  func.func @chatbot_kernel(%arg0: i32, %arg1: memref<4x8xi32, #tpu.memory_space<smem>>, %arg2: memref<16x1x128xf32, #tpu.memory_space<vmem>>, %arg3: memref<1x8x32xf32, #tpu.memory_space<vmem>>, %arg4: memref<32x128xf32, #tpu.memory_space<vmem>>, %arg5: memref<1x128xf32, #tpu.memory_space<vmem>>, %arg6: memref<1x8x128xf32, #tpu.memory_space<vmem>>, %arg7: memref<1x8x128xf32, #tpu.memory_space<vmem>>, %arg8: memref<1x8x1xi32, #tpu.memory_space<vmem>>) attributes {dimension_semantics = [#tpu.dimension_semantics<arbitrary>], iteration_bounds = array<i64: 4>, scalar_prefetch = 1 : i64, scratch_operands = 0 : i64, tpu.core_type = #tpu.core_type<tc>, window_params = [{pipeline_mode = #tpu.pipeline_mode<synchronous>, transform_indices = @transform_0, window_bounds = array<i64: 16, 1, 128>}, {transform_indices = @transform_1, window_bounds = array<i64: 1, 8, 32>}, {pipeline_mode = #tpu.pipeline_mode<synchronous>, transform_indices = @transform_2, window_bounds = array<i64: 32, 128>}, {pipeline_mode = #tpu.pipeline_mode<synchronous>, transform_indices = @transform_3, window_bounds = array<i64: 1, 128>}, {transform_indices = @transform_4, window_bounds = array<i64: 1, 8, 128>}, {transform_indices = @transform_5, window_bounds = array<i64: 1, 8, 128>}, {transform_indices = @transform_6, window_bounds = array<i64: 1, 8, 1>}]} {
    %0 = arith.index_cast %arg0 : i32 to index
    %c0 = arith.constant 0 : index
    %1 = memref.load %arg1[%0, %c0] : memref<4x8xi32, #tpu.memory_space<smem>>
    %2 = arith.index_cast %1 : i32 to index
    %c0_0 = arith.constant 0 : index
    %c0_1 = arith.constant 0 : index
    %3 = vector.load %arg2[%2, %c0_0, %c0_1] : memref<16x1x128xf32, #tpu.memory_space<vmem>>, vector<1x1x128xf32>
    %4 = vector.shape_cast %3 : vector<1x1x128xf32> to vector<1x128xf32>
    %5 = arith.index_cast %arg0 : i32 to index
    %c1 = arith.constant 1 : index
    %6 = memref.load %arg1[%5, %c1] : memref<4x8xi32, #tpu.memory_space<smem>>
    %7 = arith.index_cast %6 : i32 to index
    %c0_2 = arith.constant 0 : index
    %c0_3 = arith.constant 0 : index
    %8 = vector.load %arg2[%7, %c0_2, %c0_3] : memref<16x1x128xf32, #tpu.memory_space<vmem>>, vector<1x1x128xf32>
    %9 = vector.shape_cast %8 : vector<1x1x128xf32> to vector<1x128xf32>
    %10 = arith.index_cast %arg0 : i32 to index
    %c2 = arith.constant 2 : index
    %11 = memref.load %arg1[%10, %c2] : memref<4x8xi32, #tpu.memory_space<smem>>
    %12 = arith.index_cast %11 : i32 to index
    %c0_4 = arith.constant 0 : index
    %c0_5 = arith.constant 0 : index
    %13 = vector.load %arg2[%12, %c0_4, %c0_5] : memref<16x1x128xf32, #tpu.memory_space<vmem>>, vector<1x1x128xf32>
    %14 = vector.shape_cast %13 : vector<1x1x128xf32> to vector<1x128xf32>
    %15 = arith.index_cast %arg0 : i32 to index
    %c3 = arith.constant 3 : index
    %16 = memref.load %arg1[%15, %c3] : memref<4x8xi32, #tpu.memory_space<smem>>
    %17 = arith.index_cast %16 : i32 to index
    %c0_6 = arith.constant 0 : index
    %c0_7 = arith.constant 0 : index
    %18 = vector.load %arg2[%17, %c0_6, %c0_7] : memref<16x1x128xf32, #tpu.memory_space<vmem>>, vector<1x1x128xf32>
    %19 = vector.shape_cast %18 : vector<1x1x128xf32> to vector<1x128xf32>
    %20 = arith.index_cast %arg0 : i32 to index
    %c4 = arith.constant 4 : index
    %21 = memref.load %arg1[%20, %c4] : memref<4x8xi32, #tpu.memory_space<smem>>
    %22 = arith.index_cast %21 : i32 to index
    %c0_8 = arith.constant 0 : index
    %c0_9 = arith.constant 0 : index
    %23 = vector.load %arg2[%22, %c0_8, %c0_9] : memref<16x1x128xf32, #tpu.memory_space<vmem>>, vector<1x1x128xf32>
    %24 = vector.shape_cast %23 : vector<1x1x128xf32> to vector<1x128xf32>
    %25 = arith.index_cast %arg0 : i32 to index
    %c5 = arith.constant 5 : index
    %26 = memref.load %arg1[%25, %c5] : memref<4x8xi32, #tpu.memory_space<smem>>
    %27 = arith.index_cast %26 : i32 to index
    %c0_10 = arith.constant 0 : index
    %c0_11 = arith.constant 0 : index
    %28 = vector.load %arg2[%27, %c0_10, %c0_11] : memref<16x1x128xf32, #tpu.memory_space<vmem>>, vector<1x1x128xf32>
    %29 = vector.shape_cast %28 : vector<1x1x128xf32> to vector<1x128xf32>
    %30 = arith.index_cast %arg0 : i32 to index
    %c6 = arith.constant 6 : index
    %31 = memref.load %arg1[%30, %c6] : memref<4x8xi32, #tpu.memory_space<smem>>
    %32 = arith.index_cast %31 : i32 to index
    %c0_12 = arith.constant 0 : index
    %c0_13 = arith.constant 0 : index
    %33 = vector.load %arg2[%32, %c0_12, %c0_13] : memref<16x1x128xf32, #tpu.memory_space<vmem>>, vector<1x1x128xf32>
    %34 = vector.shape_cast %33 : vector<1x1x128xf32> to vector<1x128xf32>
    %35 = arith.index_cast %arg0 : i32 to index
    %c7 = arith.constant 7 : index
    %36 = memref.load %arg1[%35, %c7] : memref<4x8xi32, #tpu.memory_space<smem>>
    %37 = arith.index_cast %36 : i32 to index
    %c0_14 = arith.constant 0 : index
    %c0_15 = arith.constant 0 : index
    %38 = vector.load %arg2[%37, %c0_14, %c0_15] : memref<16x1x128xf32, #tpu.memory_space<vmem>>, vector<1x1x128xf32>
    %39 = vector.shape_cast %38 : vector<1x1x128xf32> to vector<1x128xf32>
    %40 = tpu.concatenate %4, %9, %14, %19, %24, %29, %34, %39 in 0 : vector<1x128xf32>, vector<1x128xf32>, vector<1x128xf32>, vector<1x128xf32>, vector<1x128xf32>, vector<1x128xf32>, vector<1x128xf32>, vector<1x128xf32> -> vector<8x128xf32>
    %c0_16 = arith.constant 0 : index
    %c0_17 = arith.constant 0 : index
    %c0_18 = arith.constant 0 : index
    %41 = vector.load %arg6[%c0_16, %c0_17, %c0_18] : memref<1x8x128xf32, #tpu.memory_space<vmem>>, vector<1x8x128xf32>
    %42 = vector.shape_cast %41 : vector<1x8x128xf32> to vector<8x128xf32>
    %43 = vector.shape_cast %40 : vector<8x128xf32> to vector<1x8x128xf32>
    tpu.vector_store %arg6[%c0_16, %c0_17, %c0_18], %43 {strides = array<i32>} : memref<1x8x128xf32, #tpu.memory_space<vmem>>, vector<1x8x128xf32>,
    %c0_19 = arith.constant 0 : index
    %c0_20 = arith.constant 0 : index
    %c0_21 = arith.constant 0 : index
    %44 = vector.load %arg3[%c0_19, %c0_20, %c0_21] : memref<1x8x32xf32, #tpu.memory_space<vmem>>, vector<1x8x32xf32>
    %45 = vector.shape_cast %44 : vector<1x8x32xf32> to vector<8x32xf32>
    %c0_22 = arith.constant 0 : index
    %c0_23 = arith.constant 0 : index
    %46 = vector.load %arg4[%c0_22, %c0_23] : memref<32x128xf32, #tpu.memory_space<vmem>>, vector<32x128xf32>
    %cst = arith.constant dense<0.000000e+00> : vector<8x128xf32>
    %47 = tpu.matmul %45, %46, %cst {dimension_numbers = #tpu.dot_dimension_numbers<[1], [0], [0], [1], [0, 0, 1, 1], [], []>} : vector<8x32xf32>, vector<32x128xf32>, vector<8x128xf32> -> vector<8x128xf32>
    %c0_24 = arith.constant 0 : index
    %c0_25 = arith.constant 0 : index
    %48 = vector.load %arg5[%c0_24, %c0_25] : memref<1x128xf32, #tpu.memory_space<vmem>>, vector<1x128xf32>
    %49 = vector.broadcast %48 : vector<1x128xf32> to vector<8x128xf32>
    %50 = arith.addf %47, %49 : vector<8x128xf32>
    %cst_26 = arith.constant dense<0xFF800000> : vector<8xf32>
    %51 = vector.multi_reduction <maximumf>, %50, %cst_26 [1] : vector<8x128xf32> to vector<8xf32>
    %52 = vector.shape_cast %51 : vector<8xf32> to vector<8x1xf32>
    %53 = vector.broadcast %52 : vector<8x1xf32> to vector<8x128xf32>
    %54 = arith.subf %50, %53 : vector<8x128xf32>
    %55 = math.exp %54 : vector<8x128xf32>
    %cst_27 = arith.constant dense<0.000000e+00> : vector<8xf32>
    %56 = vector.multi_reduction <add>, %55, %cst_27 [1] : vector<8x128xf32> to vector<8xf32>
    %57 = vector.shape_cast %56 : vector<8xf32> to vector<8x1xf32>
    %58 = tpu.reciprocal %57 {approx = true} : vector<8x1xf32> -> vector<8x1xf32>
    %59 = vector.broadcast %58 : vector<8x1xf32> to vector<8x128xf32>
    %60 = arith.mulf %55, %59 : vector<8x128xf32>
    %c0_28 = arith.constant 0 : index
    %c0_29 = arith.constant 0 : index
    %c0_30 = arith.constant 0 : index
    %61 = vector.load %arg7[%c0_28, %c0_29, %c0_30] : memref<1x8x128xf32, #tpu.memory_space<vmem>>, vector<1x8x128xf32>
    %62 = vector.shape_cast %61 : vector<1x8x128xf32> to vector<8x128xf32>
    %63 = vector.shape_cast %60 : vector<8x128xf32> to vector<1x8x128xf32>
    tpu.vector_store %arg7[%c0_28, %c0_29, %c0_30], %63 {strides = array<i32>} : memref<1x8x128xf32, #tpu.memory_space<vmem>>, vector<1x8x128xf32>,
    %64 = tpu.iota {dimensions = array<i32: 1>} : vector<8x128xi32>
    %65 = vector.broadcast %52 : vector<8x1xf32> to vector<8x128xf32>
    %66 = arith.cmpf oeq, %50, %65 : vector<8x128xf32>
    %c128_i32 = arith.constant 128 : i32
    %67 = vector.broadcast %c128_i32 : i32 to vector<8x128xi32>
    %68 = arith.select %66, %64, %67 : vector<8x128xi1>, vector<8x128xi32>
    %cst_31 = arith.constant dense<2147483647> : vector<8xi32>
    %69 = vector.multi_reduction <minsi>, %68, %cst_31 [1] : vector<8x128xi32> to vector<8xi32>
    %70 = vector.shape_cast %69 : vector<8xi32> to vector<8x1xi32>
    %c0_32 = arith.constant 0 : index
    %c0_33 = arith.constant 0 : index
    %c0_34 = arith.constant 0 : index
    %71 = vector.load %arg8[%c0_32, %c0_33, %c0_34] : memref<1x8x1xi32, #tpu.memory_space<vmem>>, vector<1x8x1xi32>
    %72 = vector.shape_cast %71 : vector<1x8x1xi32> to vector<8x1xi32>
    %73 = vector.shape_cast %70 : vector<8x1xi32> to vector<1x8x1xi32>
    tpu.vector_store %arg8[%c0_32, %c0_33, %c0_34], %73 {strides = array<i32>} : memref<1x8x1xi32, #tpu.memory_space<vmem>>, vector<1x8x1xi32>,
    return
  }
  func.func @transform_0(%arg0: i32, %arg1: memref<4x8xi32, #tpu.memory_space<smem>>) -> (i32, i32, i32) {
    %c0_i32 = arith.constant 0 : i32
    %c0_i32_0 = arith.constant 0 : i32
    %c0_i32_1 = arith.constant 0 : i32
    %c0_i32_2 = arith.constant 0 : i32
    return %c0_i32, %c0_i32_0, %c0_i32_1 : i32, i32, i32
  }
  func.func @transform_1(%arg0: i32, %arg1: memref<4x8xi32, #tpu.memory_space<smem>>) -> (i32, i32, i32) {
    %c0_i32 = arith.constant 0 : i32
    %c0_i32_0 = arith.constant 0 : i32
    %c0_i32_1 = arith.constant 0 : i32
    return %arg0, %c0_i32, %c0_i32_0 : i32, i32, i32
  }
  func.func @transform_2(%arg0: i32, %arg1: memref<4x8xi32, #tpu.memory_space<smem>>) -> (i32, i32) {
    %c0_i32 = arith.constant 0 : i32
    %c0_i32_0 = arith.constant 0 : i32
    %c0_i32_1 = arith.constant 0 : i32
    return %c0_i32, %c0_i32_0 : i32, i32
  }
  func.func @transform_3(%arg0: i32, %arg1: memref<4x8xi32, #tpu.memory_space<smem>>) -> (i32, i32) {
    %c0_i32 = arith.constant 0 : i32
    %c0_i32_0 = arith.constant 0 : i32
    %c0_i32_1 = arith.constant 0 : i32
    return %c0_i32, %c0_i32_0 : i32, i32
  }
  func.func @transform_4(%arg0: i32, %arg1: memref<4x8xi32, #tpu.memory_space<smem>>) -> (i32, i32, i32) {
    %c0_i32 = arith.constant 0 : i32
    %c0_i32_0 = arith.constant 0 : i32
    %c0_i32_1 = arith.constant 0 : i32
    return %arg0, %c0_i32, %c0_i32_0 : i32, i32, i32
  }
  func.func @transform_5(%arg0: i32, %arg1: memref<4x8xi32, #tpu.memory_space<smem>>) -> (i32, i32, i32) {
    %c0_i32 = arith.constant 0 : i32
    %c0_i32_0 = arith.constant 0 : i32
    %c0_i32_1 = arith.constant 0 : i32
    return %arg0, %c0_i32, %c0_i32_0 : i32, i32, i32
  }
  func.func @transform_6(%arg0: i32, %arg1: memref<4x8xi32, #tpu.memory_space<smem>>) -> (i32, i32, i32) {
    %c0_i32 = arith.constant 0 : i32
    %c0_i32_0 = arith.constant 0 : i32
    %c0_i32_1 = arith.constant 0 : i32
    return %arg0, %c0_i32, %c0_i32_0 : i32, i32, i32
  }
}

</mosaic_0001>

<bundles_post_ra>
// kernel: chatbot_forward.1
= control target key start
LH: loop header
LB: loop body
LE: loop exit
PB: predicated region body
PF: predicated region fallthrough
CT: control target
= control target key end

     0   :  { %s1044_s24 = smov [#allocation3]   ;;  %s1316_s0 = inlined_call_operand.hbm [shape: s32[4,8], index: 0, kind: input, shape index: {}]   ;;  %s1317_s1 = inlined_call_operand.hbm [shape: f32[16,1,128], index: 1, kind: input, shape index: {}]   ;;  %s1318_s2 = inlined_call_operand.hbm [shape: f32[4,8,32], index: 2, kind: input, shape index: {}]   ;;  %s1319_s3 = inlined_call_operand.hbm [shape: f32[32,128], index: 3, kind: input, shape index: {}]   ;;  %s1320_s4 = inlined_call_operand.vmem [shape: f32[1,128], index: 4, kind: input, shape index: {}]   ;;  %s1321_s5 = inlined_call_operand.hbm [shape: f32[4,8,128], index: 5, kind: output, shape index: {0}]   ;;  %s1322_s6 = inlined_call_operand.hbm [shape: f32[4,8,128], index: 6, kind: output, shape index: {1}]   ;;  %s1323_s7 = inlined_call_operand.vmem [shape: s32[4,8,1], index: 7, kind: output, shape index: {2}]  }
   0x1   :  { %1329 = sst [smem:[#allocation21_spill]] %s1317_s1 }
   0x2   :  { %1330 = sst [smem:[#allocation22_spill]] %s1318_s2 }
   0x3   :  { %1331 = sst [smem:[#allocation23_spill]] %s1319_s3 }
   0x4   :  { %1332 = sst [smem:[#allocation24_spill]] %s1320_s4 }
   0x5   :  { %14 = dma.hbm_to_smem %s1316_s0, 64, %s1044_s24, [#allocation2] }
   0x6   :  { %1006 = dma.done.wait [#allocation2], 64 }
   0x7   :  { %1007 = vsyncadd [#allocation2], 4294967232 }
   0x8   :  { %16 = sfence }
   0x9   :  { %17 = vsyncpa [#allocation5], 0 }
   0xa   :  { %18 = vsyncpa [#allocation8], 0 }
   0xb   :  { %20 = vsyncpa [#allocation8 + $0x1], 0 }
   0xc   :  { %21 = vsyncpa [#allocation6], 0 }
   0xd   :  { %23 = vsyncpa [#allocation6 + $0x1], 0 }
   0xe   :  { %24 = vsyncpa [#allocation12], 0 }
   0xf   :  { %26 = vsyncpa [#allocation12 + $0x1], 0  ;;  %s1099_s27 = smov 0   ;;  %s1101_s28 = smov 0  }
  0x10   :  { %s1103_s29 = smov 0   ;;  %s1105_s30 = smov 0  }
  0x11 LB: > { %1333 = sst [smem:[#allocation19_spill]] %s1038_s29  ;;  %s1120_s0 = sadd.s32 4294967295, %s1042_s30   ;;  %s1042_s30 = sphi %s1105_s30, %s1359_s30   ;;  %s1038_s29 = sphi %s1103_s29, %s1358_s29   ;;  %s1034_s28 = sphi %s1101_s28, %s1357_s28   ;;  %s1030_s27 = sphi %s1099_s27, %s1356_s27  }
  0x12   : > { %s721_s8 = sadd.s32 4294967294, %s1042_s30   ;;  %p73_p0 = scmp.ne.s32.totalorder %s1034_s28, %s1030_s27 }
  0x13   : > { %p1324_p1 = scmp.eq.s32.totalorder %s1120_s0, 0  ;;  %p145_p3 = scmp.eq.s32.totalorder %s721_s8, 3 }
  0x14   : > { %p722_p5 = scmp.ge.s32.totalorder %s1042_s30, 1  ;;  %p204_p7 = scmp.lt.s32.totalorder %s1042_s30, 5 }
  0x15   : > { %p1129_p4 = por %p1324_p1, %p73_p0  ;;  %p1134_p6 = por %p145_p3, %p73_p0 }
  0x16   : > { %p1139_p8 = pnand %p722_p5, %p204_p7  ;;  %s1045_s12 = smov [#allocation9]  }
  0x17   : > { %s1334_s9 = scalar_select %p1129_p4, 1, 0 }
  0x18   : > { %s1335_s10 = scalar_select %p1134_p6, 1, 0 }
  0x19   : > { %s1336_s11 = scalar_select %p1139_p8, 1, 0 }
  0x1a   : > { %s229_s13 = sshll.u32 %s1045_s12, 4  ;;  %p781_p9 = pneg %p1139_p8  ;;  %s230_s13 = int_to_ptr.vmem [resolvable:$true] %s229_s13 }
  0x1b   : > { %s1046_s15 = smov [#allocation4]   ;;  %s869_s17 = scalar_lea.vmem %s230_s13, 512 }
  0x1c   : > { %p1147_p10 = pnand %p781_p9, %p1324_p1  ;;  %s216_s16 = sshll.u32 %s1046_s15, 4  ;;  %s217_s16 = int_to_ptr.vmem [resolvable:$true] %s216_s16 }
  0x1d   : > { %p870_p12 = scmp.ne.s32.totalorder %s230_s13, %s869_s17  ;;  %p877_p3 = scmp.lt.s32.totalorder %s230_s13, %s230_s13 }
  0x1e   : > { %p860_p11 = pneg %p1147_p10  ;;  %p878_p5 = scmp.lt.s32.totalorder %s869_s17, %s869_s17 }
  0x20   : > { %p872_p13 = pnand %p870_p12, %p860_p11  ;;  %p879_p7 = por %p878_p5, %p877_p3 }
  0x22   : > { %p873_p0 = pneg %p872_p13 }
  0x24   : > { %p880_p9 = pnand %p879_p7, %p873_p0 }
  0x26   : > { %883 = shalt.err (!%p880_p9)
}
  0x27   : > { %s1047_s18 = smov 128   ;;  %s1048_s19 = smov 8  }
  0x28   : > { %s1338_s3 = sld [smem:[#allocation23_spill]]  ;;  %s895_s22 = scalar_lea.vmem %s217_s16, 256 }
  0x29   : > { %p896_p1 = scmp.ne.s32.totalorder %s217_s16, %s895_s22  ;;  %p903_p2 = scmp.lt.s32.totalorder %s217_s16, %s217_s16 }
  0x2a   : > { %p904_p6 = scmp.lt.s32.totalorder %s895_s22, %s895_s22 }
  0x2b   : > { %p898_p12 = pnand %p896_p1, %p860_p11 }
  0x2c   : > { %p905_p3 = por %p904_p6, %p903_p2 }
  0x2d   : > { %p899_p13 = pneg %p898_p12 }
  0x2e   : > { %787 = dma.hbm_to_vmem [thread:$0]  (!%p1147_p10), %s1338_s3, 512, %s230_s13, [#allocation8], %s1047_s18, %s1047_s18, %s1048_s19  }
  0x2f   : > { %p906_p0 = pnand %p905_p3, %p899_p13 }
  0x31   : > { %909 = shalt.err (!%p906_p0)
}
  0x32   : > { %s1049_s23 = smov 16   ;;  %s1050_s24 = smov 1  }
  0x33   : > { %s1339_s1 = sld [smem:[#allocation21_spill]]  ;;  %s1170_s8 = sadd.s32 1, %s1042_s30  }
  0x34   : > { %s57_s12 = ssub.s32 %s1042_s30, %s1170_s8  ;;  %s60_s13 = sadd.s32 1, %s1038_s29 }
  0x35   : > { %p58_p1 = scmp.eq.s32.totalorder %s57_s12, 0  ;;  %p67_p2 = scmp.ne.s32.totalorder %s1038_s29, %s1034_s28 }
  0x36   : > { %p68_p6 = scmp.eq.s32.totalorder %s1042_s30, 0  ;;  %p1341_p5 = scmp.eq.s32.totalorder %s1120_s0, 3 }
  0x37   : > { %s1179_s15 = scalar_select %p58_p1, %s1038_s29, %s60_s13  }
  0x38   : > { %p69_p11 = por %p68_p6, %p67_p2  ;;  %p1183_p7 = por %p1341_p5, %p67_p2 }
  0x39   : > { %784 = dma.hbm_to_vmem [thread:$0]  (!%p1147_p10), %s1339_s1, 256, %s217_s16, [#allocation5], %s1049_s23, %s1049_s23, %s1050_s24  }
  0x3a   : > { %1340 = sst [smem:[#allocation20_spill]] %s1179_s15  ;;  %p801_p9 = scmp.lt.s32.totalorder %s1042_s30, 4 }
  0x3b   : > { %s1342_s17 = scalar_select %p1183_p7, 1, 0 }
  0x3c   : > { %s246_s14 = sand.u32 1, %s1042_s30   ;;  %s248_s18 = sand.u32 1, %s1038_s29  }
  0x3d   : > { %s726_s16 = sshll.u32 %s248_s18, 3  ;;  %s727_s19 = sshll.u32 %s1042_s30, 7 }
  0x3e   : > { %s1343_s2 = sld [smem:[#allocation22_spill]]  ;;  %s250_s23 = scalar_lea.vmem [#allocation7], %s726_s16 }
  0x3f   : > { %s257_s24 = sshll.u32 %s250_s23, 4  ;;  %p1196_p10 = pnand %p801_p9, %p69_p11  ;;  %s258_s24 = int_to_ptr.vmem [resolvable:$true] %s257_s24 }
  0x40   : > { %s247_s26 = scalar_lea.sflag [#allocation8], %s246_s14 }
  0x41   : > { %p912_p13 = pneg %p1196_p10 }
  0x44   : > { %s1194_s22 = scalar_lea.hbm %s1343_s2, %s727_s19  ;;  %s915_s19 = scalar_lea.hbm %s1343_s2, 512 }
  0x45   : > { %s910_s12 = scalar_lea.hbm %s1194_s22, 128  ;;  %p916_p1 = scmp.lt.s32.totalorder %s1194_s22, %s1343_s2 }
  0x46   : > { %p911_p12 = scmp.ne.s32.totalorder %s1194_s22, %s910_s12  ;;  %p917_p2 = scmp.lt.s32.totalorder %s915_s19, %s910_s12 }
  0x48   : > { %p913_p3 = pnand %p912_p13, %p911_p12  ;;  %p918_p6 = por %p917_p2, %p916_p1 }
  0x4a   : > { %p914_p0 = pneg %p913_p3 }
  0x4c   : > { %p919_p11 = pnand %p918_p6, %p914_p0 }
  0x4e   : > { %922 = shalt.err (!%p919_p11)
}
  0x4f   : > { %s923_s21 = scalar_lea.vmem %s258_s24, 128  ;;  %s1051_s14 = smov [#allocation7]  }
  0x50   : > { %p924_p5 = scmp.ne.s32.totalorder %s258_s24, %s923_s21  ;;  %s928_s23 = sshll.u32 %s1051_s14, 4  ;;  %s929_s23 = int_to_ptr.vmem [resolvable:$false] %s928_s23 }
  0x51   : > { %s930_s1 = scalar_lea.vmem %s929_s23, 256  ;;  %p931_p12 = scmp.lt.s32.totalorder %s258_s24, %s929_s23 }
  0x52   : > { %p926_p9 = pnand %p924_p5, %p912_p13  ;;  %p932_p3 = scmp.lt.s32.totalorder %s930_s1, %s923_s21 }
  0x54   : > { %p927_p7 = pneg %p926_p9  ;;  %p933_p4 = por %p932_p3, %p931_p12 }
  0x56   : > { %p934_p8 = pnand %p933_p4, %p927_p7 }
  0x58   : > { %937 = shalt.err (!%p934_p8)
}
  0x59   : > { %791 = dma.hbm_to_vmem [thread:$0]  (!%p1196_p10), %s1194_s22, 128, %s258_s24, %s247_s26  }
  0x5a   : > { %p1345_p0 = scmp.ne.s32.totalorder %s1336_s11, 0 }
  0x5b   : > { %p1346_p1 = scmp.eq.s32.totalorder (!%p1345_p0), %s1120_s0, 0 }
  0x5c   : > { %266 = sbr.rel (%p1345_p0) target bundleno = 737 (0x2e1), region = 36 }
  0x61   : > { %1009 = dma.done.wait (%p1346_p1), [#allocation5], 256   ;;  %p1347_p13 = pmov %p1346_p1 }
  0x62   : > { %s272_s1 = sand.u32 1, %s1120_s0   ;;  %s1222_s12 = sand.u32 1, %s1034_s28  }
  0x63   : > { %1011 = vsyncadd (%p1347_p13), [#allocation5], 4294967040  ;;  %s1225_s13 = sshll.u32 %s1222_s12, 3  ;;  %s273_s22 = scalar_lea.sflag [#allocation8], %s272_s1 }
  0x64   : > { %s276_s24 = scalar_lea.vmem [#allocation7], %s1225_s13  ;;  %p1348_p4 = scmp.ne.s32.totalorder %s1334_s9, 0 }
  0x66   : > { %1013 = dma.done.wait (%p1348_p4), %s273_s22, 128  }
  0x67   : > { %1015 = vsyncadd (%p1348_p4), %s273_s22, 4294967168  ;;  %p1349_p8 = pmov %p1346_p1 }
  0x68   : > { %p1350_p7 = pmov %p1346_p1 }
  0x69   : > { %1017 = dma.done.wait (%p1349_p8), [#allocation8], 512  }
  0x6a   : > { %1019 = vsyncadd (%p1350_p7), [#allocation8], 4294966784  ;;  %v1052_v0 = vmov 0.0   ;;  %vm1053_vm0 = vmmov 0   ;;  %v415_v1 = vld [vmem:[#allocation9 + $0x18] sm:$0xff]  ;;  %v414_v2 = vld [vmem:[#allocation9 + $0x10] sm:$0xff]  ;;  %v507_v10 = vlaneseq }
  0x6b   : > { %756 = vmatprep.subr.mxu0 %v1052_v0  ;;  %764 = vmatprep.mubr.msk.f32.mxu0 %vm1053_vm0, %v1052_v0  ;;  %v413_v3 = vld [vmem:[#allocation9 + $0x8] sm:$0xff]  ;;  %v412_v4 = vld [vmem:[#allocation9] sm:$0xff]  ;;  %v411_v5 = vld [vmem:[%s276_s24] sm:$0xff]  ;;  %vm423_vm1 = vcmask 261120   ;;  %s1351_s4 = sld [smem:[#allocation24_spill]]  ;;  %s1243_s25 = sshll.u32 %s1120_s0, 7 }
  0x6c   : > { %757 = vmatpush3.msra.mxu0 %v415_v1  ;;  %v508_v11 = vand.u32 127, %v507_v10  ;;  %s326_s26 = sadd.s32 1, %s1243_s25  ;;  %s323_s18 = sld [smem:[#allocation3 + %s1243_s25]]  ;;  %vm396_vm4 = vcmask 1040384   ;;  %vm398_vm5 = vcmask 1041408   ;;  %vm400_vm6 = vcmask 1042432  }
  0x6d   : > { %758 = vmatprep.subr.mxu0 %v1052_v0  ;;  %s330_s19 = sadd.s32 2, %s1243_s25  ;;  %s327_s20 = sld [smem:[#allocation3 + %s326_s26]]  ;;  %vm402_vm7 = vcmask 1043456   ;;  %vm404_vm8 = vcmask 1044480   ;;  %vm406_vm9 = vcmask 1045504   ;;  %vm408_vm10 = vcmask 1046528  }
  0x6e   : > { %759 = vmatpush3.msra.mxu0 %v414_v2  ;;  %s334_s16 = sadd.s32 3, %s1243_s25  ;;  %s331_s21 = sld [smem:[#allocation3 + %s330_s19]] }
  0x6f   : > { %760 = vmatprep.subr.mxu0 %v1052_v0  ;;  %s338_s14 = sadd.s32 4, %s1243_s25  ;;  %s335_s23 = sld [smem:[#allocation3 + %s334_s16]] }
  0x70   : > { %761 = vmatpush3.msra.mxu0 %v413_v3  ;;  %s342_s1 = sadd.s32 5, %s1243_s25  ;;  %s339_s22 = sld [smem:[#allocation3 + %s338_s14]] }
  0x71   : > { %762 = vmatprep.subr.mxu0 %v1052_v0  ;;  %v743_v6 = vld [vmem:[%s1351_s4] ss:$0 sm:$0xff]  ;;  %s346_s24 = sadd.s32 6, %s1243_s25  ;;  %s343_s9 = sld [smem:[#allocation3 + %s342_s1]] }
  0x72   : > { %763 = vmatpush3.msra.mxu0 %v412_v4  ;;  %s350_s11 = sadd.s32 7, %s1243_s25  ;;  %s347_s2 = sld [smem:[#allocation3 + %s346_s24]] }
  0x73   : > { %765 = vmatmul.mubr.msk.f32.vlgmr.msra.gmra.mxu0 %vm423_vm1, %v411_v5  ;;  %s324_s3 = scalar_lea.vmem [#allocation4], %s323_s18  ;;  %s351_s4 = sld [smem:[#allocation3 + %s350_s11]] }
  0x74   : > { %v325_v23 = vld [vmem:[%s324_s3] sm:$0x1]  ;;  %s328_s15 = scalar_lea.vmem [#allocation4], %s327_s20  ;;  %s332_s29 = scalar_lea.vmem [#allocation4], %s331_s21 }
  0x75   : > { %v736_v24 = vld [vmem:[%s328_s15] ss:$0 sm:$0xff]  ;;  %s336_s26 = scalar_lea.vmem [#allocation4], %s335_s23  ;;  %s304_s18 = scalar_lea.vmem [#allocation10], %s1225_s13 }
  0x76   : > { %v737_v25 = vld [vmem:[%s332_s29] ss:$0 sm:$0xff]  ;;  %v397_v26 = vsel %vm396_vm4, %v325_v23, %v736_v24  ;;  %s340_s19 = scalar_lea.vmem [#allocation4], %s339_s22  ;;  %s550_s20 = sshll.u32 %s304_s18, 4  ;;  %s551_s20 = int_to_ptr.vmem [resolvable:$true] %s550_s20 }
  0x77   : > { %v738_v27 = vld [vmem:[%s336_s26] ss:$0 sm:$0xff]  ;;  %v399_v28 = vsel %vm398_vm5, %v397_v26, %v737_v25  ;;  %s344_s3 = scalar_lea.vmem [#allocation4], %s343_s9  ;;  %s548_s14 = scalar_lea.hbm %s1321_s5, %s1243_s25 }
  0x78   : > { %v739_v30 = vld [vmem:[%s340_s19] ss:$0 sm:$0xff]  ;;  %v401_v31 = vsel %vm400_vm6, %v399_v28, %v738_v27  ;;  %s348_s29 = scalar_lea.vmem [#allocation4], %s347_s2  ;;  %s528_s23 = scalar_lea.sflag [#allocation6], %s1222_s12 }
  0x79   : > { %v740_v32 = vld [vmem:[%s344_s3] ss:$0 sm:$0xff]  ;;  %v403_v33 = vsel %vm402_vm7, %v401_v31, %v739_v30  ;;  %s352_s15 = scalar_lea.vmem [#allocation4], %s351_s4  ;;  %s938_s1 = scalar_lea.vmem %s551_s20, 128 }
  0x7a   : > { %v741_v34 = vld [vmem:[%s348_s29] ss:$0 sm:$0xff]  ;;  %v405_v35 = vsel %vm404_vm8, %v403_v33, %v740_v32  ;;  %p939_p10 = scmp.ne.s32.totalorder %s551_s20, %s938_s1  ;;  %p1352_p2 = scmp.ne.s32.totalorder %s1342_s17, 0 }
  0x7b   : > { %v742_v36 = vld [vmem:[%s352_s15] ss:$0 sm:$0xff]  ;;  %v407_v37 = vsel %vm406_vm9, %v405_v35, %v741_v34  ;;  %s1054_s2 = smov [#allocation10]  }
  0x7c   : > { %v409_v38 = vsel %vm408_vm10, %v407_v37, %v742_v36  ;;  %p940_p6 = pnand %p939_p10, %p1352_p2  ;;  %s942_s22 = sshll.u32 %s1054_s2, 4  ;;  %s943_s22 = int_to_ptr.vmem [resolvable:$false] %s942_s22 }
  0x7d   : > { %410 = vst [vmem:[%s304_s18] sm:$0xff] %v409_v38  ;;  %s944_s4 = scalar_lea.vmem %s943_s22, 256  ;;  %p945_p5 = scmp.lt.s32.totalorder %s551_s20, %s943_s22 }
  0x7e   : > { %p941_p11 = pneg %p940_p6  ;;  %p946_p9 = scmp.lt.s32.totalorder %s944_s4, %s938_s1 }
  0x80   : > { %p947_p12 = por %p946_p9, %p945_p5 }
  0x82   : > { %p948_p3 = pnand %p947_p12, %p941_p11 }
 0x133   : > { %v493_v7 = vpop.f32.mrf.mxu0 }
 0x134   : > { %v494_v8 = vadd.f32 %v743_v6, %v493_v7 }
 0x135   : > { %v766_v9 = vpop.f32.mrf.mxu0 }
 0x136   : > { %497 = vmax.xlane.f32.xlu0 %v494_v8 }
 0x1bf   : > { %v498_v12 = vpop.xlane.xlu0 %497 }
 0x1c0   : > { %v499_v13 = vsub.f32 %v494_v8, %v498_v12  ;;  %vm509_vm2 = vcmp.eq.f32.partialorder %v494_v8, %v498_v12 }
 0x1c1   : > { %v510_v14 = vsel %vm509_vm2, %v508_v11, 128 }
 0x1c2   : > { %v500_v15 = vmul.f32 1.442695, %v499_v13  ;;  %v512_v16 = vshra.s32 %v510_v14, 16  ;;  %v511_v19 = vand.u32 65535, %v510_v14 }
 0x1c4   : > { %846 = vpow2.f32 %v500_v15  ;;  %v514_v17 = vcvt.s32.f32 %v512_v16  ;;  %v513_v21 = vcvt.s32.f32 %v511_v19 }
 0x1c6   : > { %515 = vmin.xlane.f32.xlu0 %v514_v17 }
 0x1d1   : > { %v1239_v18 = vpop.eup %846 }
 0x1d2   : > { %502 = vadd.xlane.f32.xlu1 %v1239_v18 }
 0x24f   : > { %v1245_v20 = vpop.xlane.xlu0 %515 }
 0x250   : > { %vm517_vm3 = vcmp.eq.f32.partialorder %v514_v17, %v1245_v20 }
 0x251   : > { %v518_v22 = vsel %vm517_vm3, %v513_v21, inf }
 0x252   : > { %519 = vmin.xlane.f32.xlu1 %v518_v22 }
 0x25b   : > { %v503_v29 = vpop.xlane.xlu1 %502 }
 0x25c   : > { %848 = vrcp.f32 %v503_v29 }
 0x25d   : > { %951 = shalt.err (!%p948_p3)
}
 0x25e   : > { %s952_s24 = scalar_lea.hbm %s548_s14, 128  ;;  %s956_s26 = scalar_lea.hbm %s1321_s5, 512 }
 0x25f   : > { %p953_p0 = scmp.ne.s32.totalorder %s548_s14, %s952_s24  ;;  %p957_p4 = scmp.lt.s32.totalorder %s548_s14, %s1321_s5 }
 0x260   : > { %p958_p8 = scmp.lt.s32.totalorder %s956_s26, %s952_s24 }
 0x261   : > { %p954_p1 = pnand %p953_p0, %p1352_p2 }
 0x262   : > { %p959_p7 = por %p958_p8, %p957_p4 }
 0x263   : > { %p955_p13 = pneg %p954_p1 }
 0x265   : > { %p960_p10 = pnand %p959_p7, %p955_p13 }
 0x267   : > { %963 = shalt.err (!%p960_p10)
}
 0x268   : > { %777 = dma.vmem_to_hbm [thread:$0]  (%p1352_p2), %s551_s20, 128, %s548_s14, %s528_s23  }
 0x269   : > { %s311_s29 = scalar_lea.vmem [#allocation11], %s1225_s13  ;;  %v849_v39 = vpop.eup %848  ;;  %s561_s21 = scalar_lea.hbm %s1322_s6, %s1243_s25 }
 0x26a   : > { %s563_s15 = sshll.u32 %s311_s29, 4  ;;  %v505_v40 = vmul.f32 %v849_v39, %v1239_v18  ;;  %s533_s1 = scalar_lea.sflag [#allocation12], %s1222_s12  ;;  %s564_s15 = int_to_ptr.vmem [resolvable:$true] %s563_s15 }
 0x26b   : > { %s964_s2 = scalar_lea.vmem %s564_s15, 128  ;;  %s1055_s22 = smov [#allocation11]  }
 0x26c   : > { %506 = vst [vmem:[%s311_s29] sm:$0xff] %v505_v40  ;;  %p965_p6 = scmp.ne.s32.totalorder %s564_s15, %s964_s2  ;;  %s968_s4 = sshll.u32 %s1055_s22, 4  ;;  %s969_s4 = int_to_ptr.vmem [resolvable:$false] %s968_s4 }
 0x26d   : > { %s970_s13 = scalar_lea.vmem %s969_s4, 256  ;;  %p971_p9 = scmp.lt.s32.totalorder %s564_s15, %s969_s4 }
 0x26e   : > { %p966_p11 = pnand %p965_p6, %p1352_p2  ;;  %p972_p12 = scmp.lt.s32.totalorder %s970_s13, %s964_s2 }
 0x270   : > { %p967_p5 = pneg %p966_p11  ;;  %p973_p3 = por %p972_p12, %p971_p9 }
 0x272   : > { %p974_p0 = pnand %p973_p3, %p967_p5 }
 0x274   : > { %977 = shalt.err (!%p974_p0)
}
 0x275   : > { %s978_s20 = scalar_lea.hbm %s561_s21, 128  ;;  %s982_s14 = scalar_lea.hbm %s1322_s6, 512 }
 0x276   : > { %p979_p1 = scmp.ne.s32.totalorder %s561_s21, %s978_s20  ;;  %p983_p8 = scmp.lt.s32.totalorder %s561_s21, %s1322_s6 }
 0x277   : > { %p984_p7 = scmp.lt.s32.totalorder %s982_s14, %s978_s20 }
 0x278   : > { %p980_p13 = pnand %p979_p1, %p1352_p2 }
 0x279   : > { %p985_p10 = por %p984_p7, %p983_p8 }
 0x27a   : > { %p981_p4 = pneg %p980_p13 }
 0x27c   : > { %p986_p6 = pnand %p985_p10, %p981_p4 }
 0x27e   : > { %989 = shalt.err (!%p986_p6)
}
 0x27f   : > { %778 = dma.vmem_to_hbm [thread:$0]  (%p1352_p2), %s564_s15, 128, %s561_s21, %s533_s1   ;;  %v522_v41 = vcvt.f32.s32 %v1245_v20  ;;  %vm525_vm11 = vcmask 7168  }
 0x280   : > { %p318_p11 = scmp.lt.s32.totalorder %s1120_s0, 3 }
 0x281   : > { %v523_v43 = vshll.u32 %v522_v41, 16 }
 0x282   : > { %s1361_s0 = smov (!%p318_p11, %s1120_s0), 3 }
 0x283   : > { %s734_s9 = sshll.u32 %s1361_s0, 3 }
 0x284   : > { %s321_s19 = scalar_lea.vmem %s1323_s7, %s734_s9 }
 0x2db   : > { %v520_v42 = vpop.xlane.xlu1 %519 }
 0x2dc   : > { %v521_v44 = vcvt.f32.s32 %v520_v42 }
 0x2de   : > { %v524_v45 = vadd.s32 %v523_v43, %v521_v44 }
 0x2e0   : > { %526 = vst.msk [vmem:[%s321_s19] sm:$0xff] %vm525_vm11, %v524_v45 }
 0x2e1 PF: > { %p804_p2 = scmp.ge.s32.totalorder %s1042_s30, 2  ;;  %s578_s17 = sand.u32 1, %s1030_s27  }
 0x2e2   : > { %p1353_p5 = scmp.ne.s32.totalorder %s1335_s10, 0  ;;  %s579_s0 = scalar_lea.sflag [#allocation6], %s578_s17 }
 0x2e4   : > { %p793_p9 = pnand %p804_p2, %p1353_p5 }
 0x2e6   : > { %p794_p12 = pneg %p793_p9 }
 0x2e8   : > { %1021 = dma.done.wait (%p794_p12), %s579_s0, 128  }
 0x2e9   : > { %1023 = vsyncadd (%p794_p12), %s579_s0, 4294967168  ;;  %s588_s3 = scalar_lea.sflag [#allocation12], %s578_s17 }
 0x2ea   : > { %1025 = dma.done.wait (%p794_p12), %s588_s3, 128  }
 0x2eb   : > { %1027 = vsyncadd (%p794_p12), %s588_s3, 4294967168  ;;  %s1354_s29 = sld [smem:[#allocation19_spill]]  ;;  %p29_p3 = scmp.ge.s32.totalorder %s1170_s8, 6  }
 0x2ec   : > { %s1355_s15 = sld [smem:[#allocation20_spill]]  ;;  %s1356_s27 = smov %s1034_s28 }
 0x2ed   : > { %s1359_s30 = smov %s1170_s8 }
 0x2ee   :  { %31 = sbr.rel (!%p29_p3) target bundleno = 17 (0x11), region = 127 }
 0x2f1   : > { %s1357_s28 = smov %s1354_s29 }
 0x2f2   : > { %s1358_s29 = smov %s1355_s15 }
 0x2f3   :  { %600 = vsyncpa [#allocation5], 1 }
 0x2f4   :  { %602 = vsyncpa [#allocation5 + $0x1], 1 }
 0x2f5   :  { %603 = vsyncpa [#allocation8], 1 }
 0x2f6   :  { %605 = vsyncpa [#allocation8 + $0x1], 1 }
 0x2f7   :  { %606 = vsyncpa [#allocation6], 1 }
 0x2f8   :  { %608 = vsyncpa [#allocation6 + $0x1], 1 }
 0x2f9   :  { %609 = vsyncpa [#allocation12], 1 }
 0x2fa   :  { %611 = vsyncpa [#allocation12 + $0x1], 1 }

</bundles_post_ra>
